<compile_context>
chip_gen: v6e
topology: v6e:2x2x1
jax: 0.10.0
libtpu: 0.0.40
codegen_flags: <defaults>
</compile_context>

<pallas_src>
import functools

import jax
import jax.numpy as jnp
from jax.experimental import pallas as pl
from jax.experimental.pallas import tpu as pltpu


_LANES = 128
_SUBLANES = 8
_MAX_CHUNKS = 64            # cap on the unrolled per-block chunk loop
# Budget for the double-buffered input blocks:
#   2 inputs x 2 pipeline buffers x row_tile x col_tile x itemsize  <= 8 MiB
# so the kernel fits v5e's 16 MiB scoped-VMEM default and v7x's 64 MiB VMEM
# with headroom (we also raise the scoped limit to 32 MiB, safe on all gens).
_INPUT_VMEM_BUDGET = 8 * 1024 * 1024
_VMEM_LIMIT_BYTES = 32 * 1024 * 1024


def _round_down(x, m):
    return (x // m) * m


def _cdiv(a, b):
    return -(-a // b)


def _choose_tiles(rows, spatial, itemsize):
    """Pick (row_tile, col_tile, accumulator_width) for the reduction kernel."""
    # Row tile: multiple of 8 (or the full row count when rows < 8).  Try to
    # keep >= 2 row blocks so the row axis can shard across TensorCores on
    # megacore parts; cap at 32 to keep register pressure low.
    if rows <= _SUBLANES:
        row_tile = rows
    else:
        row_tile = min(32, max(_SUBLANES, _round_down(rows // 2, _SUBLANES)))

    if spatial <= _LANES:
        # Tiny spatial extent: one full-width block, accumulator == block.
        return row_tile, spatial, spatial

    # Lane-dense accumulator width: wider for small row tiles so each grid step
    # still moves plenty of bytes without blowing up the unrolled chunk loop.
    if row_tile <= 8:
        accw = 512
    elif row_tile <= 16:
        accw = 256
    else:
        accw = 128
    accw = min(accw, _round_down(spatial, _LANES))

    budget_cols = _INPUT_VMEM_BUDGET // (2 * 2 * row_tile * itemsize)
    max_cols = min(spatial, budget_cols, accw * _MAX_CHUNKS)
    col_tile = max(accw, _round_down(max_cols, accw))
    return row_tile, col_tile, accw


def _make_iou_kernel(col_tile, accw, spatial, n_col_blocks):
    """Build the reduction kernel for static (col_tile, accw, spatial, n_k)."""
    n_full_chunks = col_tile // accw
    # Valid lanes in the last (possibly partial) column block, in (0, col_tile].
    rem = spatial - (n_col_blocks - 1) * col_tile
    tail_chunks = _cdiv(rem, accw)
    tail_partial = rem % accw          # 0 => last tail chunk is full

    def _accumulate(y_ref, p_ref, inter_ref, ysum_ref, psum_ref,
                    n_chunks, partial):
        # Read the resident lane-dense accumulators once, fold `n_chunks`
        # accw-wide lane chunks into them on the VPU, write back once.
        ii = inter_ref[...]
        yy = ysum_ref[...]
        pp = psum_ref[...]
        for c in range(n_chunks):
            yc = y_ref[:, pl.ds(c * accw, accw)].astype(jnp.float32)
            pc = p_ref[:, pl.ds(c * accw, accw)].astype(jnp.float32)
            if partial and c == n_chunks - 1:
                # Mask out-of-bounds lanes of the final partial chunk (their
                # VMEM contents are undefined for an out-of-bounds block read).
                lane = jax.lax.broadcasted_iota(jnp.int32, yc.shape, 1)
                keep = lane < partial
                yc = jnp.where(keep, yc, 0.0)
                pc = jnp.where(keep, pc, 0.0)
            ii = ii + yc * pc
            yy = yy + yc
            pp = pp + pc
        inter_ref[...] = ii
        ysum_ref[...] = yy
        psum_ref[...] = pp

    def kernel(y_ref, p_ref, inter_ref, ysum_ref, psum_ref):
        k = pl.program_id(1)

        @pl.when(k == 0)
        def _():
            inter_ref[...] = jnp.zeros_like(inter_ref)
            ysum_ref[...] = jnp.zeros_like(ysum_ref)
            psum_ref[...] = jnp.zeros_like(psum_ref)

        if n_col_blocks == 1:
            _accumulate(y_ref, p_ref, inter_ref, ysum_ref, psum_ref,
                        tail_chunks, tail_partial)
        elif rem == col_tile:
            # col_tile divides spatial evenly: every block is full, no mask.
            _accumulate(y_ref, p_ref, inter_ref, ysum_ref, psum_ref,
                        n_full_chunks, 0)
        else:
            last = n_col_blocks - 1

            @pl.when(k != last)
            def _():
                _accumulate(y_ref, p_ref, inter_ref, ysum_ref, psum_ref,
                            n_full_chunks, 0)

            @pl.when(k == last)
            def _():
                _accumulate(y_ref, p_ref, inter_ref, ysum_ref, psum_ref,
                            tail_chunks, tail_partial)

    return kernel


def _spatial_reductions(y_pred, y):
    """Compute (intersection, y_o, y_pred_o) of shape [B, C] with Pallas."""
    assert y_pred.shape == y.shape, (
        f"y_pred and y should have same shapes, got {y_pred.shape} and {y.shape}."
    )
    B, C = y.shape[0], y.shape[1]
    spatial = 1
    for s in y.shape[2:]:
        spatial *= s
    rows = B * C

    # Keep the native dtype on the HBM side (no extra up-cast pass); the kernel
    # accumulates in float32, matching torch's `.float()` semantics exactly for
    # f32/bf16/f16 inputs.  Exotic dtypes are up-cast once here.
    if y.dtype not in (jnp.float32, jnp.bfloat16, jnp.float16):
        y = y.astype(jnp.float32)
        y_pred = y_pred.astype(jnp.float32)

    y2 = y.reshape(rows, spatial)          # contiguous reshape: no copy
    p2 = y_pred.reshape(rows, spatial)

    itemsize = jnp.dtype(y2.dtype).itemsize
    row_tile, col_tile, accw = _choose_tiles(rows, spatial, itemsize)
    n_row_blocks = _cdiv(rows, row_tile)
    n_col_blocks = _cdiv(spatial, col_tile)
    rows_out = n_row_blocks * row_tile

    kernel = _make_iou_kernel(col_tile, accw, spatial, n_col_blocks)

    in_spec = pl.BlockSpec((row_tile, col_tile), lambda i, k: (i, k))
    out_spec = pl.BlockSpec((row_tile, accw), lambda i, k: (i, 0))
    out_shapes = tuple(
        jax.ShapeDtypeStruct((rows_out, accw), jnp.float32) for _ in range(3)
    )

    cost = pl.CostEstimate(
        flops=4 * rows * spatial,
        transcendentals=0,
        bytes_accessed=2 * rows * spatial * itemsize + 3 * rows_out * accw * 4,
    )

    inter, ysum, psum = pl.pallas_call(
        kernel,
        out_shape=out_shapes,
        grid_spec=pltpu.PrefetchScalarGridSpec(
            num_scalar_prefetch=0,
            grid=(n_row_blocks, n_col_blocks),
            in_specs=[in_spec, in_spec],
            out_specs=(out_spec, out_spec, out_spec),
        ),
        compiler_params=pltpu.CompilerParams(
            dimension_semantics=("parallel", "arbitrary"),
            vmem_limit_bytes=_VMEM_LIMIT_BYTES,
        ),
        cost_estimate=cost,
    )(y2, p2)

    # Final (tiny) lane reduce + reshape in plain JAX.
    inter = inter[:rows].sum(axis=-1).reshape(B, C)
    ysum = ysum[:rows].sum(axis=-1).reshape(B, C)
    psum = psum[:rows].sum(axis=-1).reshape(B, C)
    return inter, ysum, psum


def _do_metric_reduction_mean(f):
    """MONAI-style do_metric_reduction(..., reduction='mean').

    f: [B, C] with possible NaNs.  Returns (scalar f, scalar not_nans).
    """
    nans = jnp.isnan(f)
    not_nans = (~nans).astype(jnp.float32)
    f = jnp.where(nans, 0.0, f)

    nn_c = not_nans.sum(axis=1)                                   # [B]
    f_c = jnp.where(nn_c > 0, f.sum(axis=1) / jnp.where(nn_c > 0, nn_c, 1.0), 0.0)
    nn_b = (nn_c > 0).astype(jnp.float32).sum(axis=0)             # scalar
    f_out = jnp.where(nn_b > 0, f_c.sum(axis=0) / jnp.where(nn_b > 0, nn_b, 1.0), 0.0)
    return f_out, nn_b


@functools.partial(
    jax.jit,
    static_argnames=("include_background", "reduction", "get_not_nans", "ignore_empty"),
)
def mean_iou_metric_3d(
    y_pred,
    y,
    *,
    include_background=True,
    reduction="mean",
    get_not_nans=False,
    ignore_empty=True,
):
    if y.shape != y_pred.shape:
        raise ValueError(
            f"y_pred and y should have same shapes, got {y_pred.shape} and {y.shape}."
        )

    inter, y_o, y_pred_o = _spatial_reductions(y_pred, y)

    if not include_background:
        # ignore_background: per-channel reductions are independent, so dropping
        # channel 0 after the kernel is equivalent and avoids an HBM copy pass.
        inter = inter[:, 1:]
        y_o = y_o[:, 1:]
        y_pred_o = y_pred_o[:, 1:]

    union = y_o + y_pred_o - inter
    if ignore_empty:
        iou = jnp.where(y_o > 0, inter / union, jnp.float32(jnp.nan))
    else:
        iou = jnp.where(union > 0, inter / union, jnp.float32(1.0))

    assert reduction == "mean", "only 'mean' reduction implemented"
    # TODO(synk): other MONAI reduction modes ('sum', 'mean_batch', ...) not implemented.
    f, not_nans = _do_metric_reduction_mean(iou)
    return (f, not_nans) if get_not_nans else f


if __name__ == "__main__":
    key = jax.random.PRNGKey(0)

    def _reference(y_pred, y, include_background=True, ignore_empty=True):
        if not include_background:
            y_pred = y_pred[:, 1:]
            y = y[:, 1:]
        yf = y.astype(jnp.float32)
        pf = y_pred.astype(jnp.float32)
        axes = tuple(range(2, y.ndim))
        inter = jnp.sum(yf * pf, axis=axes)
        y_o = jnp.sum(yf, axis=axes)
        p_o = jnp.sum(pf, axis=axes)
        union = y_o + p_o - inter
        if ignore_empty:
            iou = jnp.where(y_o > 0, inter / union, jnp.float32(jnp.nan))
        else:
            iou = jnp.where(union > 0, inter / union, jnp.float32(1.0))
        return _do_metric_reduction_mean(iou)

    # Case 1: [B, C, D, H, W] with lane-aligned spatial extent.
    B, C, D, H, W = 2, 4, 4, 8, 8
    k1, k2, key = jax.random.split(key, 3)
    labels = jax.random.randint(k1, (B, D, H, W), 0, C)
    preds = jax.random.randint(k2, (B, D, H, W), 0, C)
    y = jax.nn.one_hot(labels, C, axis=1, dtype=jnp.float32)       # [B, C, D, H, W]
    y_pred = jax.nn.one_hot(preds, C, axis=1, dtype=jnp.float32)   # [B, C, D, H, W]
    out = jax.block_until_ready(mean_iou_metric_3d(y_pred, y))
    ref_f, _ = _reference(y_pred, y)
    assert jnp.allclose(out, ref_f, atol=1e-6, rtol=1e-6), (out, ref_f)

    # Case 2: uneven spatial size (exercises in-kernel tail masking) plus the
    # include_background=False / get_not_nans=True paths.
    B, C, D, H, W = 2, 4, 3, 7, 9
    k1, k2, key = jax.random.split(key, 3)
    labels = jax.random.randint(k1, (B, D, H, W), 0, C)
    preds = jax.random.randint(k2, (B, D, H, W), 0, C)
    y = jax.nn.one_hot(labels, C, axis=1, dtype=jnp.float32)
    y_pred = jax.nn.one_hot(preds, C, axis=1, dtype=jnp.float32)
    f2, nn2 = mean_iou_metric_3d(
        y_pred, y, include_background=False, get_not_nans=True
    )
    f2 = jax.block_until_ready(f2)
    ref_f2, ref_nn2 = _reference(y_pred, y, include_background=False)
    assert jnp.allclose(f2, ref_f2, atol=1e-6, rtol=1e-6), (f2, ref_f2)
    assert jnp.allclose(nn2, ref_nn2), (nn2, ref_nn2)

    print("KERNEL_OK")
</pallas_src>

<mosaic_0001>
module attributes {stable_mosaic.version = 11 : i64} {
  func.func @kernel(%arg0: i32, %arg1: i32, %arg2: memref<8x256xf32, #tpu.memory_space<vmem>>, %arg3: memref<8x256xf32, #tpu.memory_space<vmem>>, %arg4: memref<8x256xf32, #tpu.memory_space<vmem>>, %arg5: memref<8x256xf32, #tpu.memory_space<vmem>>, %arg6: memref<8x256xf32, #tpu.memory_space<vmem>>) attributes {dimension_semantics = [#tpu.dimension_semantics<parallel>, #tpu.dimension_semantics<arbitrary>], iteration_bounds = array<i64: 1, 1>, scalar_prefetch = 0 : i64, scratch_operands = 0 : i64, tpu.core_type = #tpu.core_type<tc>, window_params = [{transform_indices = @transform_0, window_bounds = array<i64: 8, 256>}, {transform_indices = @transform_1, window_bounds = array<i64: 8, 256>}, {transform_indices = @transform_2, window_bounds = array<i64: 8, 256>}, {transform_indices = @transform_3, window_bounds = array<i64: 8, 256>}, {transform_indices = @transform_4, window_bounds = array<i64: 8, 256>}]} {
    %c0_i32 = arith.constant 0 : i32
    %0 = arith.cmpi eq, %arg1, %c0_i32 : i32
    %1 = arith.extui %0 : i1 to i32
    %c0_i32_0 = arith.constant 0 : i32
    %2 = arith.cmpi ne, %1, %c0_i32_0 : i32
    scf.if %2 {
      %cst = arith.constant 0.000000e+00 : f32
      %15 = vector.broadcast %cst : f32 to vector<8x256xf32>
      %c0_16 = arith.constant 0 : index
      %c0_17 = arith.constant 0 : index
      %16 = vector.load %arg4[%c0_16, %c0_17] : memref<8x256xf32, #tpu.memory_space<vmem>>, vector<8x256xf32>
      tpu.vector_store %arg4[%c0_16, %c0_17], %15 {strides = array<i32>} : memref<8x256xf32, #tpu.memory_space<vmem>>, vector<8x256xf32>,
      %cst_18 = arith.constant 0.000000e+00 : f32
      %17 = vector.broadcast %cst_18 : f32 to vector<8x256xf32>
      %c0_19 = arith.constant 0 : index
      %c0_20 = arith.constant 0 : index
      %18 = vector.load %arg5[%c0_19, %c0_20] : memref<8x256xf32, #tpu.memory_space<vmem>>, vector<8x256xf32>
      tpu.vector_store %arg5[%c0_19, %c0_20], %17 {strides = array<i32>} : memref<8x256xf32, #tpu.memory_space<vmem>>, vector<8x256xf32>,
      %cst_21 = arith.constant 0.000000e+00 : f32
      %19 = vector.broadcast %cst_21 : f32 to vector<8x256xf32>
      %c0_22 = arith.constant 0 : index
      %c0_23 = arith.constant 0 : index
      %20 = vector.load %arg6[%c0_22, %c0_23] : memref<8x256xf32, #tpu.memory_space<vmem>>, vector<8x256xf32>
      tpu.vector_store %arg6[%c0_22, %c0_23], %19 {strides = array<i32>} : memref<8x256xf32, #tpu.memory_space<vmem>>, vector<8x256xf32>,
    } else {
    }
    %c0 = arith.constant 0 : index
    %c0_1 = arith.constant 0 : index
    %3 = vector.load %arg4[%c0, %c0_1] : memref<8x256xf32, #tpu.memory_space<vmem>>, vector<8x256xf32>
    %c0_2 = arith.constant 0 : index
    %c0_3 = arith.constant 0 : index
    %4 = vector.load %arg5[%c0_2, %c0_3] : memref<8x256xf32, #tpu.memory_space<vmem>>, vector<8x256xf32>
    %c0_4 = arith.constant 0 : index
    %c0_5 = arith.constant 0 : index
    %5 = vector.load %arg6[%c0_4, %c0_5] : memref<8x256xf32, #tpu.memory_space<vmem>>, vector<8x256xf32>
    %c0_6 = arith.constant 0 : index
    %c0_7 = arith.constant 0 : index
    %6 = vector.load %arg2[%c0_6, %c0_7] : memref<8x256xf32, #tpu.memory_space<vmem>>, vector<8x256xf32>
    %c0_8 = arith.constant 0 : index
    %c0_9 = arith.constant 0 : index
    %7 = vector.load %arg3[%c0_8, %c0_9] : memref<8x256xf32, #tpu.memory_space<vmem>>, vector<8x256xf32>
    %8 = arith.mulf %6, %7 : vector<8x256xf32>
    %9 = arith.addf %3, %8 : vector<8x256xf32>
    %10 = arith.addf %4, %6 : vector<8x256xf32>
    %11 = arith.addf %5, %7 : vector<8x256xf32>
    %c0_10 = arith.constant 0 : index
    %c0_11 = arith.constant 0 : index
    %12 = vector.load %arg4[%c0_10, %c0_11] : memref<8x256xf32, #tpu.memory_space<vmem>>, vector<8x256xf32>
    tpu.vector_store %arg4[%c0_10, %c0_11], %9 {strides = array<i32>} : memref<8x256xf32, #tpu.memory_space<vmem>>, vector<8x256xf32>,
    %c0_12 = arith.constant 0 : index
    %c0_13 = arith.constant 0 : index
    %13 = vector.load %arg5[%c0_12, %c0_13] : memref<8x256xf32, #tpu.memory_space<vmem>>, vector<8x256xf32>
    tpu.vector_store %arg5[%c0_12, %c0_13], %10 {strides = array<i32>} : memref<8x256xf32, #tpu.memory_space<vmem>>, vector<8x256xf32>,
    %c0_14 = arith.constant 0 : index
    %c0_15 = arith.constant 0 : index
    %14 = vector.load %arg6[%c0_14, %c0_15] : memref<8x256xf32, #tpu.memory_space<vmem>>, vector<8x256xf32>
    tpu.vector_store %arg6[%c0_14, %c0_15], %11 {strides = array<i32>} : memref<8x256xf32, #tpu.memory_space<vmem>>, vector<8x256xf32>,
    return
  }
  func.func @transform_0(%arg0: i32, %arg1: i32) -> (i32, i32) {
    %c0_i32 = arith.constant 0 : i32
    return %arg0, %arg1 : i32, i32
  }
  func.func @transform_1(%arg0: i32, %arg1: i32) -> (i32, i32) {
    %c0_i32 = arith.constant 0 : i32
    return %arg0, %arg1 : i32, i32
  }
  func.func @transform_2(%arg0: i32, %arg1: i32) -> (i32, i32) {
    %c0_i32 = arith.constant 0 : i32
    %c0_i32_0 = arith.constant 0 : i32
    return %arg0, %c0_i32 : i32, i32
  }
  func.func @transform_3(%arg0: i32, %arg1: i32) -> (i32, i32) {
    %c0_i32 = arith.constant 0 : i32
    %c0_i32_0 = arith.constant 0 : i32
    return %arg0, %c0_i32 : i32, i32
  }
  func.func @transform_4(%arg0: i32, %arg1: i32) -> (i32, i32) {
    %c0_i32 = arith.constant 0 : i32
    %c0_i32_0 = arith.constant 0 : i32
    return %arg0, %c0_i32 : i32, i32
  }
}

</mosaic_0001>

<bundles_post_ra>
// kernel: mean_iou_metric_3d.1
= control target key start
LH: loop header
LB: loop body
LE: loop exit
PB: predicated region body
PF: predicated region fallthrough
CT: control target
= control target key end

     0   :  { %s116_s0 = inlined_call_operand.vmem [shape: f32[8,256], index: 0, kind: input, shape index: {}]   ;;  %s117_s1 = inlined_call_operand.vmem [shape: f32[8,256], index: 1, kind: input, shape index: {}]   ;;  %s118_s3 = inlined_call_operand.vmem [shape: f32[8,256], index: 3, kind: output, shape index: {1}]   ;;  %s119_s4 = inlined_call_operand.vmem [shape: f32[8,256], index: 4, kind: output, shape index: {2}]   ;;  %s120_s2 = inlined_call_operand.vmem [shape: f32[8,256], index: 2, kind: output, shape index: {0}]  }
   0x1   :  { %v30_v0 = vld [vmem:[%s116_s0] sm:$0xff]  ;;  %v31_v2 = vld [vmem:[%s116_s0 + $0x8] sm:$0xff] }
   0x2   :  { %v32_v1 = vld [vmem:[%s117_s1] sm:$0xff]  ;;  %v33_v4 = vld [vmem:[%s117_s1 + $0x8] sm:$0xff]  ;;  %44 = vst [vmem:[%s118_s3] sm:$0xff] %v30_v0  ;;  %45 = vst [vmem:[%s118_s3 + $0x8] sm:$0xff] %v31_v2 }
   0x3   :  { %v34_v3 = vmul.f32 %v32_v1, %v30_v0  ;;  %v35_v5 = vmul.f32 %v33_v4, %v31_v2  ;;  %46 = vst [vmem:[%s119_s4] sm:$0xff] %v32_v1  ;;  %47 = vst [vmem:[%s119_s4 + $0x8] sm:$0xff] %v33_v4 }
   0x5   :  { %42 = vst [vmem:[%s120_s2] sm:$0xff] %v34_v3  ;;  %43 = vst [vmem:[%s120_s2 + $0x8] sm:$0xff] %v35_v5 }

</bundles_post_ra>
